<compile_context>
chip_gen: v6e
topology: v6e:2x2x1
jax: 0.10.0
libtpu: 0.0.40
codegen_flags: <defaults>
</compile_context>

<pallas_src>
import functools

import jax
import jax.numpy as jnp
from jax.experimental import pallas as pl
from jax.experimental.pallas import tpu as pltpu

_BN_EPS = 1e-5


def _round_up(x, m):
    return (x + m - 1) // m * m


def _compiler_params(resident_bytes):
    # Scoped-VMEM budget sized to the actual resident set (v5e default scoped
    # limit is only 16 MiB; v7x physical VMEM is 64 MiB).  Batch tiling keeps
    # the per-step footprint small, so 2x + headroom is generous.
    limit = int(min(max(2 * resident_bytes + (4 << 20), 16 << 20), 64 << 20))
    return pltpu.CompilerParams(
        dimension_semantics=("parallel",),
        vmem_limit_bytes=limit)


# ---------------------------------------------------------------------------
# Pass 1: gcn1 (adjacency folded into k1) + per-batch-tile BN partial stats.
# ---------------------------------------------------------------------------
def _gcn1_stats_kernel(xf_ref, k1_ref, vec_ref, h1_ref, stats_ref):
    h1 = jnp.dot(xf_ref[...], k1_ref[...],
                 preferred_element_type=jnp.float32)
    h1 = h1 + vec_ref[0:1, :]                       # + b1 (tiled over nodes)
    h1_ref[...] = h1.astype(h1_ref.dtype)
    # Partial BN statistics over this batch tile (f32 accumulation).
    # Zero-padded batch rows contribute exactly b1 / b1^2 per lane; the wrapper
    # subtracts that closed-form contribution, so no in-kernel masking needed.
    stats_ref[0:1, :] = jnp.sum(h1, axis=0, keepdims=True)
    stats_ref[1:2, :] = jnp.sum(h1 * h1, axis=0, keepdims=True)


# ---------------------------------------------------------------------------
# Pass 2: fused BN normalize+affine, gcn2 (kron-folded), fc head.
# ---------------------------------------------------------------------------
def _norm_gcn2_fc_kernel(h1_ref, k2_ref, wfc_ref, vec_ref, out_ref):
    nh = k2_ref.shape[0]
    out_pad = out_ref.shape[1]
    mm_dtype = k2_ref.dtype
    # vec rows: 0 = gamma*rsqrt(var+eps) per lane, 1 = beta - mean*scale per
    # lane (both precomputed in the wrapper), 2 = b2 per lane, 3 = bfc (padded).
    h1n = (h1_ref[...].astype(jnp.float32) * vec_ref[0:1, 0:nh]
           + vec_ref[1:2, 0:nh])
    h2 = jnp.dot(h1n.astype(mm_dtype), k2_ref[...],
                 preferred_element_type=jnp.float32)
    h2 = h2 + vec_ref[2:3, 0:nh]                    # + b2
    out = jnp.dot(h2.astype(mm_dtype), wfc_ref[...],
                  preferred_element_type=jnp.float32)
    out_ref[...] = out + vec_ref[3:4, 0:out_pad]    # + bfc (lane-padded, unmasked store)


def gcn2_forward(x, adj, params, *, matmul_dtype=jnp.float32, block_b=256):
    """x: [B, N, Fin] float32; adj ("network"): [N, N] float32."""
    w1, b1, w2, b2, gamma, beta, wfc_t, bfc = params
    b_sz, nodes, fin = x.shape
    hidden = w1.shape[1]
    out_dim = wfc_t.shape[1]
    nh = nodes * hidden
    nfin = nodes * fin
    out_pad = _round_up(out_dim, 128)
    mm_size = jnp.dtype(matmul_dtype).itemsize

    # Batch tiling (parallel grid axis -> both TCs on v7x, pipelined DMA).
    tile_b = min(block_b, _round_up(b_sz, 8))
    b_pad = _round_up(b_sz, tile_b)
    n_tiles = b_pad // tile_b

    # --- weight plumbing (cache these for a fixed graph) ---------------------
    k1 = jnp.kron(adj.T, w1).astype(matmul_dtype)          # [N*Fin, N*H]
    k2 = jnp.kron(adj.T, w2).astype(matmul_dtype)          # [N*H,  N*H]
    wfc_pad = jnp.zeros((nh, out_pad), matmul_dtype)
    wfc_pad = wfc_pad.at[:, :out_dim].set(wfc_t.astype(matmul_dtype))

    b1_lane = jnp.tile(b1, nodes)                          # bias at lane n*H+h
    b2_lane = jnp.tile(b2, nodes)

    x_flat = x.reshape(b_sz, nfin).astype(matmul_dtype)
    if b_pad != b_sz:
        x_flat = jnp.zeros((b_pad, nfin), matmul_dtype).at[:b_sz].set(x_flat)

    # ---------------- pass 1: gcn1 + BN partial statistics -------------------
    vec_a = jnp.zeros((8, nh), jnp.float32).at[0].set(b1_lane)
    resident_a = (2 * tile_b * nfin * mm_size          # x tiles (double buffered)
                  + nfin * nh * mm_size                # k1
                  + 8 * nh * 4                         # vec_a
                  + 2 * tile_b * nh * mm_size          # h1 tiles
                  + 2 * 2 * nh * 4)                    # stats blocks
    h1, stats = pl.pallas_call(
        _gcn1_stats_kernel,
        grid=(n_tiles,),
        in_specs=[pl.BlockSpec((tile_b, nfin), lambda i: (i, 0)),
                  pl.BlockSpec((nfin, nh), lambda i: (0, 0)),
                  pl.BlockSpec((8, nh), lambda i: (0, 0))],
        out_specs=(pl.BlockSpec((tile_b, nh), lambda i: (i, 0)),
                   pl.BlockSpec((None, 2, nh), lambda i: (i, 0, 0))),
        out_shape=(jax.ShapeDtypeStruct((b_pad, nh), matmul_dtype),
                   jax.ShapeDtypeStruct((n_tiles, 2, nh), jnp.float32)),
        compiler_params=_compiler_params(resident_a),
    )(x_flat, k1, vec_a)

    # ------------- tiny BN stats reduction (plain JAX, O(N*H)) ---------------
    bsum = jnp.sum(stats[:, 0, :], axis=0)                 # [N*H]
    sqsum = jnp.sum(stats[:, 1, :], axis=0)                # [N*H]
    n_zpad = b_pad - b_sz                                  # padded rows hold exactly b1
    bsum = bsum - n_zpad * b1_lane
    sqsum = sqsum - n_zpad * (b1_lane * b1_lane)
    inv_count = 1.0 / float(b_sz * hidden)                 # BN stats over (batch, hidden)
    mean_n = jnp.sum(bsum.reshape(nodes, hidden), axis=1) * inv_count
    ex2_n = jnp.sum(sqsum.reshape(nodes, hidden), axis=1) * inv_count
    var_n = ex2_n - mean_n * mean_n                        # biased variance (E[x^2]-mean^2)
    scale_n = gamma * jax.lax.rsqrt(var_n + _BN_EPS)       # fused BN affine
    shift_n = beta - mean_n * scale_n
    scale_lane = jnp.repeat(scale_n, hidden)
    shift_lane = jnp.repeat(shift_n, hidden)

    # ---------------- pass 2: normalize + gcn2 + fc head ---------------------
    lane_b = max(nh, out_pad)
    vec_b = jnp.zeros((8, lane_b), jnp.float32)
    vec_b = vec_b.at[0, :nh].set(scale_lane)
    vec_b = vec_b.at[1, :nh].set(shift_lane)
    vec_b = vec_b.at[2, :nh].set(b2_lane)
    vec_b = vec_b.at[3, :out_dim].set(bfc)
    resident_b = (2 * tile_b * nh * mm_size                # h1 tiles
                  + nh * nh * mm_size                      # k2
                  + nh * out_pad * mm_size                 # wfc
                  + 8 * lane_b * 4                         # vec_b
                  + 2 * tile_b * out_pad * 4)              # out tiles
    out_p = pl.pallas_call(
        _norm_gcn2_fc_kernel,
        grid=(n_tiles,),
        in_specs=[pl.BlockSpec((tile_b, nh), lambda i: (i, 0)),
                  pl.BlockSpec((nh, nh), lambda i: (0, 0)),
                  pl.BlockSpec((nh, out_pad), lambda i: (0, 0)),
                  pl.BlockSpec((8, lane_b), lambda i: (0, 0))],
        out_specs=pl.BlockSpec((tile_b, out_pad), lambda i: (i, 0)),
        out_shape=jax.ShapeDtypeStruct((b_pad, out_pad), jnp.float32),
        compiler_params=_compiler_params(resident_b),
    )(h1, k2, wfc_pad, vec_b)

    return out_p[:b_sz, :out_dim]


def gcn2_reference(x, adj, params):
    """Straightforward JAX restatement of the PyTorch forward (for validation)."""
    w1, b1, w2, b2, gamma, beta, wfc_t, bfc = params
    h1 = jnp.einsum('nm,bmf,fh->bnh', adj, x, w1) + b1
    mean = jnp.mean(h1, axis=(0, 2), keepdims=True)
    var = jnp.mean((h1 - mean) ** 2, axis=(0, 2), keepdims=True)
    h1n = (h1 - mean) / jnp.sqrt(var + _BN_EPS) * gamma[None, :, None] \
        + beta[None, :, None]
    h2 = jnp.einsum('nm,bmh,hk->bnk', adj, h1n, w2) + b2
    flat = h2.reshape(x.shape[0], -1)
    return flat @ wfc_t + bfc


def make_params(key, node_dim, input_dim, output_dim, hidden_dim):
    ks = jax.random.split(key, 6)
    w1 = jax.random.normal(ks[0], (input_dim, hidden_dim), jnp.float32) * 0.1
    b1 = jax.random.normal(ks[1], (hidden_dim,), jnp.float32) * 0.01
    w2 = jax.random.normal(ks[2], (hidden_dim, hidden_dim), jnp.float32) * 0.1
    b2 = jax.random.normal(ks[3], (hidden_dim,), jnp.float32) * 0.01
    gamma = jnp.ones((node_dim,), jnp.float32)        # BatchNorm1d default init
    beta = jnp.zeros((node_dim,), jnp.float32)
    # fc1: torch weight is [O, N*H]; row-major flatten multiplies weight.T.
    wfc_t = jax.random.normal(ks[4], (node_dim * hidden_dim, output_dim),
                              jnp.float32) * 0.05
    bfc = jax.random.normal(ks[5], (output_dim,), jnp.float32) * 0.01
    return (w1, b1, w2, b2, gamma, beta, wfc_t, bfc)


def make_adjacency(key, node_dim):
    # Symmetric 0/1 adjacency with self-loops, row-normalized.
    a = (jax.random.uniform(key, (node_dim, node_dim)) > 0.5).astype(jnp.float32)
    a = jnp.maximum(a, a.T)
    a = a + jnp.eye(node_dim, dtype=jnp.float32)
    a = jnp.minimum(a, 1.0)
    deg = jnp.sum(a, axis=1, keepdims=True)
    return a / deg


if __name__ == "__main__":
    batch = 2
    node_dim = 8       # graph nodes (also the BatchNorm1d channel count)
    input_dim = 16     # per-node input feature dim
    hidden_dim = 32
    output_dim = 10

    key = jax.random.PRNGKey(0)
    kx, ka, kp = jax.random.split(key, 3)

    x = jax.random.normal(kx, (batch, node_dim, input_dim), jnp.float32)
    network = make_adjacency(ka, node_dim)
    params = make_params(kp, node_dim, input_dim, output_dim, hidden_dim)

    ref = gcn2_reference(x, network, params)

    # f32 matmul path: tight validation against the reference.
    fwd = jax.jit(functools.partial(gcn2_forward, matmul_dtype=jnp.float32))
    out = jax.block_until_ready(fwd(x, network, params))
    assert out.shape == (batch, output_dim)
    assert bool(jnp.all(jnp.isfinite(out)))
    assert bool(jnp.allclose(out, ref, rtol=2e-3, atol=2e-3)), \
        f"max abs err {float(jnp.max(jnp.abs(out - ref)))}"

    # bf16 MXU-operand path (recommended at non-toy shapes): compile + loose check.
    fwd_bf16 = jax.jit(functools.partial(gcn2_forward, matmul_dtype=jnp.bfloat16))
    out_bf16 = jax.block_until_ready(fwd_bf16(x, network, params))
    assert bool(jnp.all(jnp.isfinite(out_bf16)))
    assert bool(jnp.allclose(out_bf16, ref, rtol=1e-1, atol=1e-1)), \
        f"bf16 max abs err {float(jnp.max(jnp.abs(out_bf16 - ref)))}"

    print("KERNEL_OK")
</pallas_src>

<mosaic_0001>
module attributes {stable_mosaic.version = 11 : i64} {
  func.func @_gcn1_stats_kernel(%arg0: i32, %arg1: memref<8x128xf32, #tpu.memory_space<vmem>>, %arg2: memref<128x256xf32, #tpu.memory_space<vmem>>, %arg3: memref<8x256xf32, #tpu.memory_space<vmem>>, %arg4: memref<8x256xf32, #tpu.memory_space<vmem>>, %arg5: memref<1x2x256xf32, #tpu.memory_space<vmem>>) attributes {dimension_semantics = [#tpu.dimension_semantics<parallel>], iteration_bounds = array<i64: 1>, scalar_prefetch = 0 : i64, scratch_operands = 0 : i64, tpu.core_type = #tpu.core_type<tc>, window_params = [{transform_indices = @transform_0, window_bounds = array<i64: 8, 128>}, {pipeline_mode = #tpu.pipeline_mode<synchronous>, transform_indices = @transform_1, window_bounds = array<i64: 128, 256>}, {pipeline_mode = #tpu.pipeline_mode<synchronous>, transform_indices = @transform_2, window_bounds = array<i64: 8, 256>}, {transform_indices = @transform_3, window_bounds = array<i64: 8, 256>}, {transform_indices = @transform_4, window_bounds = array<i64: 1, 2, 256>}]} {
    %c0 = arith.constant 0 : index
    %c0_0 = arith.constant 0 : index
    %0 = vector.load %arg1[%c0, %c0_0] : memref<8x128xf32, #tpu.memory_space<vmem>>, vector<8x128xf32>
    %c0_1 = arith.constant 0 : index
    %c0_2 = arith.constant 0 : index
    %1 = vector.load %arg2[%c0_1, %c0_2] : memref<128x256xf32, #tpu.memory_space<vmem>>, vector<128x256xf32>
    %cst = arith.constant dense<0.000000e+00> : vector<8x256xf32>
    %2 = tpu.matmul %0, %1, %cst {dimension_numbers = #tpu.dot_dimension_numbers<[1], [0], [0], [1], [0, 0, 1, 1], [], []>} : vector<8x128xf32>, vector<128x256xf32>, vector<8x256xf32> -> vector<8x256xf32>
    %c0_3 = arith.constant 0 : index
    %c0_4 = arith.constant 0 : index
    %3 = vector.load %arg3[%c0_3, %c0_4] : memref<8x256xf32, #tpu.memory_space<vmem>>, vector<1x256xf32>
    %4 = vector.broadcast %3 : vector<1x256xf32> to vector<8x256xf32>
    %5 = arith.addf %2, %4 : vector<8x256xf32>
    %c0_5 = arith.constant 0 : index
    %c0_6 = arith.constant 0 : index
    %6 = vector.load %arg4[%c0_5, %c0_6] : memref<8x256xf32, #tpu.memory_space<vmem>>, vector<8x256xf32>
    tpu.vector_store %arg4[%c0_5, %c0_6], %5 {strides = array<i32>} : memref<8x256xf32, #tpu.memory_space<vmem>>, vector<8x256xf32>,
    %cst_7 = arith.constant dense<0.000000e+00> : vector<256xf32>
    %7 = vector.multi_reduction <add>, %5, %cst_7 [0] : vector<8x256xf32> to vector<256xf32>
    %8 = vector.shape_cast %7 : vector<256xf32> to vector<1x256xf32>
    %c0_8 = arith.constant 0 : index
    %c0_9 = arith.constant 0 : index
    %c0_10 = arith.constant 0 : index
    %9 = vector.load %arg5[%c0_8, %c0_9, %c0_10] : memref<1x2x256xf32, #tpu.memory_space<vmem>>, vector<1x1x256xf32>
    %10 = vector.shape_cast %9 : vector<1x1x256xf32> to vector<1x256xf32>
    %11 = vector.shape_cast %8 : vector<1x256xf32> to vector<1x1x256xf32>
    tpu.vector_store %arg5[%c0_8, %c0_9, %c0_10], %11 {strides = array<i32>} : memref<1x2x256xf32, #tpu.memory_space<vmem>>, vector<1x1x256xf32>,
    %12 = arith.mulf %5, %5 : vector<8x256xf32>
    %cst_11 = arith.constant dense<0.000000e+00> : vector<256xf32>
    %13 = vector.multi_reduction <add>, %12, %cst_11 [0] : vector<8x256xf32> to vector<256xf32>
    %14 = vector.shape_cast %13 : vector<256xf32> to vector<1x256xf32>
    %c0_12 = arith.constant 0 : index
    %c1 = arith.constant 1 : index
    %c0_13 = arith.constant 0 : index
    %15 = vector.load %arg5[%c0_12, %c1, %c0_13] : memref<1x2x256xf32, #tpu.memory_space<vmem>>, vector<1x1x256xf32>
    %16 = vector.shape_cast %15 : vector<1x1x256xf32> to vector<1x256xf32>
    %17 = vector.shape_cast %14 : vector<1x256xf32> to vector<1x1x256xf32>
    tpu.vector_store %arg5[%c0_12, %c1, %c0_13], %17 {strides = array<i32>} : memref<1x2x256xf32, #tpu.memory_space<vmem>>, vector<1x1x256xf32>,
    return
  }
  func.func @transform_0(%arg0: i32) -> (i32, i32) {
    %c0_i32 = arith.constant 0 : i32
    %c0_i32_0 = arith.constant 0 : i32
    return %arg0, %c0_i32 : i32, i32
  }
  func.func @transform_1(%arg0: i32) -> (i32, i32) {
    %c0_i32 = arith.constant 0 : i32
    %c0_i32_0 = arith.constant 0 : i32
    %c0_i32_1 = arith.constant 0 : i32
    return %c0_i32, %c0_i32_0 : i32, i32
  }
  func.func @transform_2(%arg0: i32) -> (i32, i32) {
    %c0_i32 = arith.constant 0 : i32
    %c0_i32_0 = arith.constant 0 : i32
    %c0_i32_1 = arith.constant 0 : i32
    return %c0_i32, %c0_i32_0 : i32, i32
  }
  func.func @transform_3(%arg0: i32) -> (i32, i32) {
    %c0_i32 = arith.constant 0 : i32
    %c0_i32_0 = arith.constant 0 : i32
    return %arg0, %c0_i32 : i32, i32
  }
  func.func @transform_4(%arg0: i32) -> (i32, i32, i32) {
    %c0_i32 = arith.constant 0 : i32
    %c0_i32_0 = arith.constant 0 : i32
    %c0_i32_1 = arith.constant 0 : i32
    return %arg0, %c0_i32, %c0_i32_0 : i32, i32, i32
  }
}

module attributes {stable_mosaic.version = 11 : i64} {
  func.func @_norm_gcn2_fc_kernel(%arg0: i32, %arg1: memref<8x256xf32, #tpu.memory_space<vmem>>, %arg2: memref<256x256xf32, #tpu.memory_space<vmem>>, %arg3: memref<256x128xf32, #tpu.memory_space<vmem>>, %arg4: memref<8x256xf32, #tpu.memory_space<vmem>>, %arg5: memref<8x128xf32, #tpu.memory_space<vmem>>) attributes {dimension_semantics = [#tpu.dimension_semantics<parallel>], iteration_bounds = array<i64: 1>, scalar_prefetch = 0 : i64, scratch_operands = 0 : i64, tpu.core_type = #tpu.core_type<tc>, window_params = [{transform_indices = @transform_0, window_bounds = array<i64: 8, 256>}, {pipeline_mode = #tpu.pipeline_mode<synchronous>, transform_indices = @transform_1, window_bounds = array<i64: 256, 256>}, {pipeline_mode = #tpu.pipeline_mode<synchronous>, transform_indices = @transform_2, window_bounds = array<i64: 256, 128>}, {pipeline_mode = #tpu.pipeline_mode<synchronous>, transform_indices = @transform_3, window_bounds = array<i64: 8, 256>}, {transform_indices = @transform_4, window_bounds = array<i64: 8, 128>}]} {
    %c0 = arith.constant 0 : index
    %c0_0 = arith.constant 0 : index
    %0 = vector.load %arg1[%c0, %c0_0] : memref<8x256xf32, #tpu.memory_space<vmem>>, vector<8x256xf32>
    %c0_1 = arith.constant 0 : index
    %c0_2 = arith.constant 0 : index
    %1 = vector.load %arg4[%c0_1, %c0_2] : memref<8x256xf32, #tpu.memory_space<vmem>>, vector<1x256xf32>
    %2 = vector.broadcast %1 : vector<1x256xf32> to vector<8x256xf32>
    %3 = arith.mulf %0, %2 : vector<8x256xf32>
    %c1 = arith.constant 1 : index
    %c0_3 = arith.constant 0 : index
    %4 = vector.load %arg4[%c1, %c0_3] : memref<8x256xf32, #tpu.memory_space<vmem>>, vector<1x256xf32>
    %5 = vector.broadcast %4 : vector<1x256xf32> to vector<8x256xf32>
    %6 = arith.addf %3, %5 : vector<8x256xf32>
    %c0_4 = arith.constant 0 : index
    %c0_5 = arith.constant 0 : index
    %7 = vector.load %arg2[%c0_4, %c0_5] : memref<256x256xf32, #tpu.memory_space<vmem>>, vector<256x256xf32>
    %cst = arith.constant dense<0.000000e+00> : vector<8x256xf32>
    %8 = tpu.matmul %6, %7, %cst {dimension_numbers = #tpu.dot_dimension_numbers<[1], [0], [0], [1], [0, 0, 1, 1], [], []>} : vector<8x256xf32>, vector<256x256xf32>, vector<8x256xf32> -> vector<8x256xf32>
    %c2 = arith.constant 2 : index
    %c0_6 = arith.constant 0 : index
    %9 = vector.load %arg4[%c2, %c0_6] : memref<8x256xf32, #tpu.memory_space<vmem>>, vector<1x256xf32>
    %10 = vector.broadcast %9 : vector<1x256xf32> to vector<8x256xf32>
    %11 = arith.addf %8, %10 : vector<8x256xf32>
    %c0_7 = arith.constant 0 : index
    %c0_8 = arith.constant 0 : index
    %12 = vector.load %arg3[%c0_7, %c0_8] : memref<256x128xf32, #tpu.memory_space<vmem>>, vector<256x128xf32>
    %cst_9 = arith.constant dense<0.000000e+00> : vector<8x128xf32>
    %13 = tpu.matmul %11, %12, %cst_9 {dimension_numbers = #tpu.dot_dimension_numbers<[1], [0], [0], [1], [0, 0, 1, 1], [], []>} : vector<8x256xf32>, vector<256x128xf32>, vector<8x128xf32> -> vector<8x128xf32>
    %c3 = arith.constant 3 : index
    %c0_10 = arith.constant 0 : index
    %14 = vector.load %arg4[%c3, %c0_10] : memref<8x256xf32, #tpu.memory_space<vmem>>, vector<1x128xf32>
    %15 = vector.broadcast %14 : vector<1x128xf32> to vector<8x128xf32>
    %16 = arith.addf %13, %15 : vector<8x128xf32>
    %c0_11 = arith.constant 0 : index
    %c0_12 = arith.constant 0 : index
    %17 = vector.load %arg5[%c0_11, %c0_12] : memref<8x128xf32, #tpu.memory_space<vmem>>, vector<8x128xf32>
    tpu.vector_store %arg5[%c0_11, %c0_12], %16 {strides = array<i32>} : memref<8x128xf32, #tpu.memory_space<vmem>>, vector<8x128xf32>,
    return
  }
  func.func @transform_0(%arg0: i32) -> (i32, i32) {
    %c0_i32 = arith.constant 0 : i32
    %c0_i32_0 = arith.constant 0 : i32
    return %arg0, %c0_i32 : i32, i32
  }
  func.func @transform_1(%arg0: i32) -> (i32, i32) {
    %c0_i32 = arith.constant 0 : i32
    %c0_i32_0 = arith.constant 0 : i32
    %c0_i32_1 = arith.constant 0 : i32
    return %c0_i32, %c0_i32_0 : i32, i32
  }
  func.func @transform_2(%arg0: i32) -> (i32, i32) {
    %c0_i32 = arith.constant 0 : i32
    %c0_i32_0 = arith.constant 0 : i32
    %c0_i32_1 = arith.constant 0 : i32
    return %c0_i32, %c0_i32_0 : i32, i32
  }
  func.func @transform_3(%arg0: i32) -> (i32, i32) {
    %c0_i32 = arith.constant 0 : i32
    %c0_i32_0 = arith.constant 0 : i32
    %c0_i32_1 = arith.constant 0 : i32
    return %c0_i32, %c0_i32_0 : i32, i32
  }
  func.func @transform_4(%arg0: i32) -> (i32, i32) {
    %c0_i32 = arith.constant 0 : i32
    %c0_i32_0 = arith.constant 0 : i32
    return %arg0, %c0_i32 : i32, i32
  }
}

</mosaic_0001>

<bundles_post_ra>
// kernel: tile.13
= control target key start
LH: loop header
LB: loop body
LE: loop exit
PB: predicated region body
PF: predicated region fallthrough
CT: control target
= control target key end

     0   :  { %s22_s0 = inlined_call_operand.vmem [shape: f32[32], index: 0, kind: input, shape index: {}]   ;;  %s23_s1 = inlined_call_operand.vmem [shape: f32[8,32], index: 1, kind: output, shape index: {}]  }
   0x1   :  { %v4_v0 = vld [vmem:[%s22_s0] ss:$0 sm:$0xff] }
   0x2   :  { %5 = vst [vmem:[%s23_s1] sm:$0xff] %v4_v0 }

// kernel: gcn2_forward.2
= control target key start
LH: loop header
LB: loop body
LE: loop exit
PB: predicated region body
PF: predicated region fallthrough
CT: control target
= control target key end

     0   :  { %v214_v3 = vmov 0.0   ;;  %v51_v34 = vlaneseq  ;;  %v215_v51 = vmov 1966171168   ;;  %s355_s1 = inlined_call_operand.vmem [shape: f32[128,256], index: 1, kind: input, shape index: {}]   ;;  %s356_s0 = inlined_call_operand.vmem [shape: f32[8,128], index: 0, kind: input, shape index: {}]   ;;  %s357_s2 = inlined_call_operand.vmem [shape: f32[8,256], index: 2, kind: input, shape index: {}]   ;;  %s358_s3 = inlined_call_operand.vmem [shape: f32[8,256], index: 3, kind: output, shape index: {0}]   ;;  %s359_s4 = inlined_call_operand.vmem [shape: f32[1,2,256], index: 4, kind: output, shape index: {1}]  }
   0x1   :  { %v48_v0 = vld [vmem:[%s355_s1 + $0xf8] sm:$0xff]  ;;  %v47_v1 = vld [vmem:[%s355_s1 + $0xf0] sm:$0xff]  ;;  %v46_v2 = vld [vmem:[%s355_s1 + $0xe8] sm:$0xff]  ;;  %125 = vmatprep.mubr.f32.mxu0 %v214_v3  ;;  %v150_v52 = vunpack.c.l.s4 %v215_v51 }
   0x2   :  { %61 = vmatprep.subr.mxu0 %v48_v0  ;;  %v45_v4 = vld [vmem:[%s355_s1 + $0xe0] sm:$0xff]  ;;  %v44_v5 = vld [vmem:[%s355_s1 + $0xd8] sm:$0xff]  ;;  %v43_v6 = vld [vmem:[%s355_s1 + $0xd0] sm:$0xff]  ;;  %v52_v35 = vshrl.u32 %v51_v34, 7  ;;  %vm166_vm0 = vcmp.lt.s32.totalorder %v51_v34, 256 }
   0x3   :  { %62 = vmatpush1.msra.mxu0 %v47_v1  ;;  %v42_v7 = vld [vmem:[%s355_s1 + $0xc8] sm:$0xff]  ;;  %v41_v8 = vld [vmem:[%s355_s1 + $0xc0] sm:$0xff]  ;;  %v40_v9 = vld [vmem:[%s355_s1 + $0xb8] sm:$0xff]  ;;  %v151_v61 = vunpack.c.0.s8 %v150_v52 }
   0x4   :  { %63 = vmatprep.subr.mxu0 %v46_v2  ;;  %v39_v10 = vld [vmem:[%s355_s1 + $0xb0] sm:$0xff]  ;;  %v38_v11 = vld [vmem:[%s355_s1 + $0xa8] sm:$0xff]  ;;  %v37_v12 = vld [vmem:[%s355_s1 + $0xa0] sm:$0xff]  ;;  %v53_v36 = vsub.s32 0, %v52_v35  ;;  %v57_v38 = vsub.s32 1, %v52_v35 }
   0x5   :  { %64 = vmatpush1.msra.mxu0 %v45_v4  ;;  %v36_v13 = vld [vmem:[%s355_s1 + $0x98] sm:$0xff]  ;;  %v35_v14 = vld [vmem:[%s355_s1 + $0x90] sm:$0xff]  ;;  %v34_v15 = vld [vmem:[%s355_s1 + $0x88] sm:$0xff] }
   0x6   :  { %65 = vmatprep.subr.mxu0 %v44_v5  ;;  %v33_v16 = vld [vmem:[%s355_s1 + $0x80] sm:$0xff]  ;;  %v32_v17 = vld [vmem:[%s355_s1 + $0x78] sm:$0xff]  ;;  %v31_v18 = vld [vmem:[%s355_s1 + $0x70] sm:$0xff] }
   0x7   :  { %66 = vmatpush1.msra.mxu0 %v43_v6  ;;  %v30_v19 = vld [vmem:[%s355_s1 + $0x68] sm:$0xff]  ;;  %v29_v20 = vld [vmem:[%s355_s1 + $0x60] sm:$0xff]  ;;  %v28_v21 = vld [vmem:[%s355_s1 + $0x58] sm:$0xff]  ;;  %v154_v6 = vsub.s32 %v151_v61, %v52_v35 }
   0x8   :  { %67 = vmatprep.subr.mxu0 %v42_v7  ;;  %v27_v22 = vld [vmem:[%s355_s1 + $0x50] sm:$0xff]  ;;  %v26_v23 = vld [vmem:[%s355_s1 + $0x48] sm:$0xff]  ;;  %v25_v24 = vld [vmem:[%s355_s1 + $0x40] sm:$0xff] }
   0x9   :  { %68 = vmatpush1.msra.mxu0 %v41_v8  ;;  %v24_v25 = vld [vmem:[%s355_s1 + $0x38] sm:$0xff]  ;;  %v23_v26 = vld [vmem:[%s355_s1 + $0x30] sm:$0xff]  ;;  %v22_v27 = vld [vmem:[%s355_s1 + $0x28] sm:$0xff] }
   0xa   :  { %69 = vmatprep.subr.mxu0 %v40_v9  ;;  %v21_v28 = vld [vmem:[%s355_s1 + $0x20] sm:$0xff]  ;;  %v20_v29 = vld [vmem:[%s355_s1 + $0x18] sm:$0xff]  ;;  %v19_v30 = vld [vmem:[%s355_s1 + $0x10] sm:$0xff] }
   0xb   :  { %70 = vmatpush1.msra.mxu0 %v39_v10  ;;  %v18_v31 = vld [vmem:[%s355_s1 + $0x8] sm:$0xff]  ;;  %v17_v32 = vld [vmem:[%s355_s1] sm:$0xff] }
   0xc   :  { %71 = vmatprep.subr.mxu0 %v38_v11  ;;  %v16_v33 = vld [vmem:[%s356_s0] sm:$0xff] }
   0xd   :  { %72 = vmatpush1.msra.mxu0 %v37_v12  ;;  %v49_v37 = vld [vmem:[%s357_s2] ss:$8 sm:$0x3] }
   0xe   :  { %73 = vmatprep.subr.mxu0 %v36_v13  ;;  %v54_v39 = vrot.slane %v49_v37, %v53_v36  ;;  %v58_v40 = vrot.slane %v49_v37, %v57_v38 }
   0xf   :  { %74 = vmatpush1.msra.mxu0 %v35_v14 }
  0x10   :  { %75 = vmatprep.subr.mxu0 %v34_v15 }
  0x11   :  { %76 = vmatpush1.msra.mxu0 %v33_v16 }
  0x12   :  { %77 = vmatprep.subr.mxu0 %v32_v17 }
  0x13   :  { %78 = vmatpush1.msra.mxu0 %v31_v18 }
  0x14   :  { %79 = vmatprep.subr.mxu0 %v30_v19 }
  0x15   :  { %80 = vmatpush1.msra.mxu0 %v29_v20 }
  0x16   :  { %81 = vmatprep.subr.mxu0 %v28_v21 }
  0x17   :  { %82 = vmatpush1.msra.mxu0 %v27_v22 }
  0x18   :  { %83 = vmatprep.subr.mxu0 %v26_v23 }
  0x19   :  { %84 = vmatpush1.msra.mxu0 %v25_v24 }
  0x1a   :  { %85 = vmatprep.subr.mxu0 %v24_v25 }
  0x1b   :  { %86 = vmatpush1.msra.mxu0 %v23_v26 }
  0x1c   :  { %87 = vmatprep.subr.mxu0 %v22_v27 }
  0x1d   :  { %88 = vmatpush1.msra.mxu0 %v21_v28 }
  0x1e   :  { %89 = vmatprep.subr.mxu0 %v20_v29 }
  0x1f   :  { %90 = vmatpush1.msra.mxu0 %v19_v30 }
  0x20   :  { %91 = vmatprep.subr.mxu0 %v18_v31 }
  0x21   :  { %92 = vmatpush1.msra.mxu0 %v17_v32 }
  0x22   :  { %126 = vmatmul.mubr.f32.vlgmr.msra.gmra.mxu0 %v16_v33 }
  0xe2   :  { %v127_v41 = vpop.f32.mrf.mxu0 }
  0xe3   :  { %v128_v42 = vadd.f32 %v127_v41, %v54_v39 }
  0xe4   :  { %v129_v43 = vpop.f32.mrf.mxu0 }
  0xe5   :  { %132 = vst [vmem:[%s358_s3] sm:$0xff] %v128_v42  ;;  %v134_v44 = vrot.slane %v128_v42, 4  ;;  %v169_v45 = vmul.f32 %v128_v42, %v128_v42  ;;  %v130_v46 = vadd.f32 %v129_v43, %v58_v40 }
  0xe7   :  { %v135_v47 = vadd.f32 %v134_v44, %v128_v42  ;;  %v171_v48 = vrot.slane %v169_v45, 4  ;;  %133 = vst [vmem:[%s358_s3 + $0x8] sm:$0xff] %v130_v46  ;;  %v140_v49 = vrot.slane %v130_v46, 4  ;;  %v170_v50 = vmul.f32 %v130_v46, %v130_v46 }
  0xe9   :  { %v136_v53 = vrot.slane %v135_v47, 2  ;;  %v172_v54 = vadd.f32 %v171_v48, %v169_v45  ;;  %v141_v55 = vadd.f32 %v140_v49, %v130_v46  ;;  %v177_v56 = vrot.slane %v170_v50, 4 }
  0xeb   :  { %v137_v57 = vadd.f32 %v136_v53, %v135_v47  ;;  %v173_v58 = vrot.slane %v172_v54, 2  ;;  %v142_v59 = vrot.slane %v141_v55, 2  ;;  %v178_v60 = vadd.f32 %v177_v56, %v170_v50 }
  0xed   :  { %v138_v62 = vrot.slane %v137_v57, 1  ;;  %v174_v63 = vadd.f32 %v173_v58, %v172_v54  ;;  %v143_v0 = vadd.f32 %v142_v59, %v141_v55  ;;  %v179_v1 = vrot.slane %v178_v60, 2 }
  0xef   :  { %v175_v2 = vrot.slane %v174_v63, 1  ;;  %v144_v3 = vrot.slane %v143_v0, 1  ;;  %v180_v4 = vadd.f32 %v179_v1, %v178_v60  ;;  %v139_v5 = vadd.f32 %v138_v62, %v137_v57 }
  0xf1   :  { %v145_v7 = vadd.f32 %v144_v3, %v143_v0  ;;  %v181_v8 = vrot.slane %v180_v4, 1  ;;  %v176_v9 = vadd.f32 %v175_v2, %v174_v63 }
  0xf3   :  { %v148_v10 = vcombine.low %v139_v5, %v145_v7  ;;  %v182_v11 = vadd.f32 %v181_v8, %v180_v4 }
  0xf5   :  { %v155_v12 = vrot.slane %v148_v10, %v154_v6  ;;  %v185_v13 = vcombine.low %v176_v9, %v182_v11 }
  0xf7   :  { %v162_v14 = vrot.slane %v155_v12, %v154_v6  ;;  %v192_v15 = vrot.slane %v185_v13, %v154_v6 }
  0xf9   :  { %168 = vst.msk [vmem:[%s359_s4] ss:$2 sm:$0x3] %vm166_vm0, %v162_v14  ;;  %v199_v16 = vrot.slane %v192_v15, %v154_v6 }
  0xfb   :  { %211 = vst.msk [vmem:[%s359_s4 + $0x1] ss:$2 sm:$0x3] %vm166_vm0, %v199_v16 }

// kernel: gcn2_forward.3
= control target key start
LH: loop header
LB: loop body
LE: loop exit
PB: predicated region body
PF: predicated region fallthrough
CT: control target
= control target key end

     0   :  { %v21_v14 = vlaneseq  ;;  %s692_s1 = inlined_call_operand.vmem [shape: f32[256,256], index: 1, kind: input, shape index: {}]   ;;  %s693_s0 = inlined_call_operand.vmem [shape: f32[8,256], index: 0, kind: input, shape index: {}]   ;;  %s694_s3 = inlined_call_operand.vmem [shape: f32[8,256], index: 3, kind: input, shape index: {}]   ;;  %s695_s2 = inlined_call_operand.vmem [shape: f32[256,128], index: 2, kind: input, shape index: {}]   ;;  %s696_s4 = inlined_call_operand.vmem [shape: f32[8,128], index: 4, kind: output, shape index: {}]  }
   0x1   :  { %v79_v0 = vld [vmem:[%s692_s1 + $0xf8] sm:$0xff]  ;;  %v78_v1 = vld [vmem:[%s692_s1 + $0xf0] sm:$0xff]  ;;  %v77_v2 = vld [vmem:[%s692_s1 + $0xe8] sm:$0xff] }
   0x2   :  { %125 = vmatprep.subr.mxu0 %v79_v0  ;;  %v76_v3 = vld [vmem:[%s692_s1 + $0xe0] sm:$0xff]  ;;  %v75_v4 = vld [vmem:[%s692_s1 + $0xd8] sm:$0xff]  ;;  %v74_v5 = vld [vmem:[%s692_s1 + $0xd0] sm:$0xff]  ;;  %v420_v19 = vshrl.u32 %v21_v14, 7 }
   0x3   :  { %126 = vmatpush1.msra.mxu0 %v78_v1  ;;  %v73_v6 = vld [vmem:[%s692_s1 + $0xc8] sm:$0xff]  ;;  %v72_v7 = vld [vmem:[%s692_s1 + $0xc0] sm:$0xff]  ;;  %v71_v8 = vld [vmem:[%s692_s1 + $0xb8] sm:$0xff] }
   0x4   :  { %127 = vmatprep.subr.mxu0 %v77_v2  ;;  %v70_v9 = vld [vmem:[%s692_s1 + $0xb0] sm:$0xff]  ;;  %v69_v10 = vld [vmem:[%s692_s1 + $0xa8] sm:$0xff]  ;;  %v68_v11 = vld [vmem:[%s692_s1 + $0xa0] sm:$0xff]  ;;  %v435_v24 = vsub.s32 1, %v420_v19 }
   0x5   :  { %128 = vmatpush1.msra.mxu0 %v76_v3  ;;  %v67_v12 = vld [vmem:[%s692_s1 + $0x98] sm:$0xff]  ;;  %v66_v13 = vld [vmem:[%s692_s1 + $0x90] sm:$0xff]  ;;  %v65_v15 = vld [vmem:[%s692_s1 + $0x88] sm:$0xff] }
   0x6   :  { %129 = vmatprep.subr.mxu0 %v75_v4  ;;  %v64_v16 = vld [vmem:[%s692_s1 + $0x80] sm:$0xff]  ;;  %v63_v17 = vld [vmem:[%s692_s1 + $0x78] sm:$0xff]  ;;  %v62_v18 = vld [vmem:[%s692_s1 + $0x70] sm:$0xff] }
   0x7   :  { %130 = vmatpush1.msra.mxu0 %v74_v5  ;;  %v61_v20 = vld [vmem:[%s692_s1 + $0x68] sm:$0xff]  ;;  %v60_v21 = vld [vmem:[%s692_s1 + $0x60] sm:$0xff]  ;;  %v59_v22 = vld [vmem:[%s692_s1 + $0x58] sm:$0xff] }
   0x8   :  { %131 = vmatprep.subr.mxu0 %v73_v6  ;;  %v58_v23 = vld [vmem:[%s692_s1 + $0x50] sm:$0xff]  ;;  %v57_v25 = vld [vmem:[%s692_s1 + $0x48] sm:$0xff]  ;;  %v56_v26 = vld [vmem:[%s692_s1 + $0x40] sm:$0xff] }
   0x9   :  { %132 = vmatpush1.msra.mxu0 %v72_v7  ;;  %v55_v27 = vld [vmem:[%s692_s1 + $0x38] sm:$0xff]  ;;  %v54_v28 = vld [vmem:[%s692_s1 + $0x30] sm:$0xff]  ;;  %v18_v29 = vld [vmem:[%s693_s0 + $0x8] sm:$0xff] }
   0xa   :  { %133 = vmatprep.subr.mxu0 %v71_v8  ;;  %v455_v30 = vld [vmem:[%s694_s3] ss:$8 sm:$0x3]  ;;  %v460_v31 = vld [vmem:[%s694_s3 + $0x1] ss:$8 sm:$0x3] }
   0xb   :  { %134 = vmatpush1.msra.mxu0 %v70_v9  ;;  %v28_v32 = vrot.slane %v455_v30, %v435_v24  ;;  %v43_v33 = vrot.slane %v460_v31, %v435_v24  ;;  %v227_v34 = vld [vmem:[%s695_s2 + $0xf8] sm:$0xff]  ;;  %v226_v36 = vld [vmem:[%s695_s2 + $0xf0] sm:$0xff]  ;;  %v53_v37 = vld [vmem:[%s692_s1 + $0x28] sm:$0xff] }
   0xc   :  { %135 = vmatprep.subr.mxu0 %v69_v10  ;;  %v211_v35 = vld [vmem:[%s695_s2 + $0x78] sm:$0xff]  ;;  %306 = vmatprep.subr.mxu1 %v227_v34  ;;  %v210_v38 = vld [vmem:[%s695_s2 + $0x70] sm:$0xff]  ;;  %v52_v39 = vld [vmem:[%s692_s1 + $0x20] sm:$0xff] }
   0xd   :  { %136 = vmatpush1.msra.mxu0 %v68_v11  ;;  %v32_v40 = vmul.f32 %v28_v32, %v18_v29  ;;  %307 = vmatpush3.msra.mxu1 %v211_v35  ;;  %v225_v41 = vld [vmem:[%s695_s2 + $0xe8] sm:$0xff]  ;;  %v51_v42 = vld [vmem:[%s692_s1 + $0x18] sm:$0xff]  ;;  %v50_v43 = vld [vmem:[%s692_s1 + $0x10] sm:$0xff] }
   0xe   :  { %137 = vmatprep.subr.mxu0 %v67_v12  ;;  %308 = vmatprep.subr.mxu1 %v226_v36  ;;  %v209_v45 = vld [vmem:[%s695_s2 + $0x68] sm:$0xff]  ;;  %v224_v47 = vld [vmem:[%s695_s2 + $0xe0] sm:$0xff]  ;;  %v111_v50 = vld [vmem:[%s692_s1 + $0x1f8] sm:$0xff] }
   0xf   :  { %138 = vmatpush1.msra.mxu0 %v66_v13  ;;  %v47_v44 = vadd.f32 %v43_v33, %v32_v40  ;;  %309 = vmatpush3.msra.mxu1 %v210_v38  ;;  %v49_v46 = vld [vmem:[%s692_s1 + $0x8] sm:$0xff]  ;;  %v48_v48 = vld [vmem:[%s692_s1] sm:$0xff]  ;;  %v223_v51 = vld [vmem:[%s695_s2 + $0xd8] sm:$0xff] }
  0x10   :  { %139 = vmatprep.subr.mxu0 %v65_v15  ;;  %310 = vmatprep.subr.mxu1 %v225_v41  ;;  %v208_v49 = vld [vmem:[%s695_s2 + $0x60] sm:$0xff]  ;;  %v110_v52 = vld [vmem:[%s692_s1 + $0x1f0] sm:$0xff]  ;;  %v207_v53 = vld [vmem:[%s695_s2 + $0x58] sm:$0xff] }
  0x11   :  { %140 = vmatpush1.msra.mxu0 %v64_v16  ;;  %189 = vmatprep.mubr.f32.mxu0 %v47_v44  ;;  %v109_v54 = vld [vmem:[%s692_s1 + $0x1e8] sm:$0xff]  ;;  %v222_v55 = vld [vmem:[%s695_s2 + $0xd0] sm:$0xff]  ;;  %v108_v56 = vld [vmem:[%s692_s1 + $0x1e0] sm:$0xff] }
  0x12   :  { %141 = vmatprep.subr.mxu0 %v63_v17  ;;  %311 = vmatpush3.msra.mxu1 %v209_v45  ;;  %v206_v57 = vld [vmem:[%s695_s2 + $0x50] sm:$0xff]  ;;  %v107_v58 = vld [vmem:[%s692_s1 + $0x1d8] sm:$0xff]  ;;  %v221_v59 = vld [vmem:[%s695_s2 + $0xc8] sm:$0xff] }
  0x13   :  { %142 = vmatpush1.msra.mxu0 %v62_v18  ;;  %312 = vmatprep.subr.mxu1 %v224_v47  ;;  %v106_v60 = vld [vmem:[%s692_s1 + $0x1d0] sm:$0xff]  ;;  %v205_v61 = vld [vmem:[%s695_s2 + $0x48] sm:$0xff]  ;;  %v220_v63 = vld [vmem:[%s695_s2 + $0xc0] sm:$0xff] }
  0x14   :  { %143 = vmatprep.subr.mxu0 %v61_v20  ;;  %313 = vmatpush3.msra.mxu1 %v208_v49  ;;  %v105_v62 = vld [vmem:[%s692_s1 + $0x1c8] sm:$0xff]  ;;  %v104_v0 = vld [vmem:[%s692_s1 + $0x1c0] sm:$0xff]  ;;  %v103_v2 = vld [vmem:[%s692_s1 + $0x1b8] sm:$0xff] }
  0x15   :  { %144 = vmatpush1.msra.mxu0 %v60_v21  ;;  %314 = vmatprep.subr.mxu1 %v223_v51  ;;  %v204_v1 = vld [vmem:[%s695_s2 + $0x40] sm:$0xff]  ;;  %v219_v3 = vld [vmem:[%s695_s2 + $0xb8] sm:$0xff]  ;;  %v102_v4 = vld [vmem:[%s692_s1 + $0x1b0] sm:$0xff] }
  0x16   :  { %145 = vmatprep.subr.mxu0 %v59_v22  ;;  %315 = vmatpush3.msra.mxu1 %v207_v53  ;;  %v203_v5 = vld [vmem:[%s695_s2 + $0x38] sm:$0xff]  ;;  %v101_v6 = vld [vmem:[%s692_s1 + $0x1a8] sm:$0xff]  ;;  %v218_v7 = vld [vmem:[%s695_s2 + $0xb0] sm:$0xff] }
  0x17   :  { %146 = vmatpush1.msra.mxu0 %v58_v23  ;;  %316 = vmatprep.subr.mxu1 %v222_v55  ;;  %v100_v8 = vld [vmem:[%s692_s1 + $0x1a0] sm:$0xff]  ;;  %v202_v9 = vld [vmem:[%s695_s2 + $0x30] sm:$0xff]  ;;  %v99_v10 = vld [vmem:[%s692_s1 + $0x198] sm:$0xff] }
  0x18   :  { %147 = vmatprep.subr.mxu0 %v57_v25  ;;  %317 = vmatpush3.msra.mxu1 %v206_v57  ;;  %v217_v11 = vld [vmem:[%s695_s2 + $0xa8] sm:$0xff]  ;;  %v98_v12 = vld [vmem:[%s692_s1 + $0x190] sm:$0xff]  ;;  %v216_v15 = vld [vmem:[%s695_s2 + $0xa0] sm:$0xff] }
  0x19   :  { %148 = vmatpush1.msra.mxu0 %v56_v26  ;;  %318 = vmatprep.subr.mxu1 %v221_v59  ;;  %v201_v13 = vld [vmem:[%s695_s2 + $0x28] sm:$0xff]  ;;  %v96_v16 = vld [vmem:[%s692_s1 + $0x180] sm:$0xff]  ;;  %v95_v18 = vld [vmem:[%s692_s1 + $0x178] sm:$0xff]  ;;  %v23_v26 = vsub.s32 0, %v420_v19 }
  0x1a   :  { %149 = vmatprep.subr.mxu0 %v55_v27  ;;  %319 = vmatpush3.msra.mxu1 %v205_v61  ;;  %v97_v14 = vld [vmem:[%s692_s1 + $0x188] sm:$0xff]  ;;  %v200_v17 = vld [vmem:[%s695_s2 + $0x20] sm:$0xff]  ;;  %v215_v20 = vld [vmem:[%s695_s2 + $0x98] sm:$0xff] }
  0x1b   :  { %150 = vmatpush1.msra.mxu0 %v54_v28  ;;  %320 = vmatprep.subr.mxu1 %v220_v63  ;;  %v94_v21 = vld [vmem:[%s692_s1 + $0x170] sm:$0xff]  ;;  %v199_v22 = vld [vmem:[%s695_s2 + $0x18] sm:$0xff]  ;;  %v93_v23 = vld [vmem:[%s692_s1 + $0x168] sm:$0xff]  ;;  %v24_v32 = vrot.slane %v455_v30, %v23_v26 }
  0x1c   :  { %151 = vmatprep.subr.mxu0 %v53_v37  ;;  %321 = vmatpush3.msra.mxu1 %v204_v1  ;;  %v92_v25 = vld [vmem:[%s692_s1 + $0x160] sm:$0xff]  ;;  %v91_v27 = vld [vmem:[%s692_s1 + $0x158] sm:$0xff]  ;;  %v90_v28 = vld [vmem:[%s692_s1 + $0x150] sm:$0xff]  ;;  %v39_v37 = vrot.slane %v460_v31, %v23_v26 }
  0x1d   :  { %152 = vmatpush1.msra.mxu0 %v52_v39  ;;  %322 = vmatprep.subr.mxu1 %v219_v3  ;;  %v89_v29 = vld [vmem:[%s692_s1 + $0x148] sm:$0xff]  ;;  %v88_v19 = vld [vmem:[%s692_s1 + $0x140] sm:$0xff]  ;;  %v87_v33 = vld [vmem:[%s692_s1 + $0x138] sm:$0xff] }
  0x1e   :  { %153 = vmatprep.subr.mxu0 %v51_v42  ;;  %323 = vmatpush3.msra.mxu1 %v203_v5  ;;  %v17_v34 = vld [vmem:[%s693_s0] sm:$0xff]  ;;  %v86_v35 = vld [vmem:[%s692_s1 + $0x130] sm:$0xff]  ;;  %v85_v36 = vld [vmem:[%s692_s1 + $0x128] sm:$0xff] }
  0x1f   :  { %154 = vmatpush1.msra.mxu0 %v50_v43  ;;  %324 = vmatprep.subr.mxu1 %v218_v7  ;;  %v84_v30 = vld [vmem:[%s692_s1 + $0x120] sm:$0xff]  ;;  %v31_v38 = vmul.f32 %v24_v32, %v17_v34  ;;  %v83_v39 = vld [vmem:[%s692_s1 + $0x118] sm:$0xff]  ;;  %v82_v40 = vld [vmem:[%s692_s1 + $0x110] sm:$0xff] }
  0x20   :  { %155 = vmatprep.subr.mxu0 %v49_v46  ;;  %325 = vmatpush3.msra.mxu1 %v202_v9  ;;  %v81_v41 = vld [vmem:[%s692_s1 + $0x108] sm:$0xff]  ;;  %v80_v31 = vld [vmem:[%s692_s1 + $0x100] sm:$0xff]  ;;  %v214_v43 = vld [vmem:[%s695_s2 + $0x90] sm:$0xff] }
  0x21   :  { %156 = vmatpush1.msra.mxu0 %v48_v48  ;;  %326 = vmatprep.subr.mxu1 %v217_v11  ;;  %v46_v42 = vadd.f32 %v39_v37, %v31_v38  ;;  %v198_v44 = vld [vmem:[%s695_s2 + $0x10] sm:$0xff]  ;;  %v213_v45 = vld [vmem:[%s695_s2 + $0x88] sm:$0xff]  ;;  %v212_v47 = vld [vmem:[%s695_s2 + $0x80] sm:$0xff] }
  0x22   :  { %157 = vmatprep.subr.mxu0 %v111_v50  ;;  %327 = vmatpush3.msra.mxu1 %v201_v13  ;;  %v197_v46 = vld [vmem:[%s695_s2 + $0x8] sm:$0xff]  ;;  %v196_v48 = vld [vmem:[%s695_s2] sm:$0xff] }
  0x23   :  { %158 = vmatpush2.msra.mxu0 %v110_v52  ;;  %328 = vmatprep.subr.mxu1 %v216_v15  ;;  %v305_v49 = vld [vmem:[%s694_s3 + $0x2] ss:$8 sm:$0x3]  ;;  %v228_v57 = vld [vmem:[%s694_s3 + $0x3] ss:$0 sm:$0xff] }
  0x24   :  { %159 = vmatprep.subr.mxu0 %v109_v54  ;;  %329 = vmatpush3.msra.mxu1 %v200_v17  ;;  %v122_v50 = vrot.slane %v305_v49, %v435_v24  ;;  %v118_v51 = vrot.slane %v305_v49, %v23_v26 }
  0x25   :  { %160 = vmatpush2.msra.mxu0 %v108_v56  ;;  %330 = vmatprep.subr.mxu1 %v215_v20 }
  0x26   :  { %161 = vmatprep.subr.mxu0 %v107_v58  ;;  %331 = vmatpush3.msra.mxu1 %v199_v22 }
  0x27   :  { %162 = vmatpush2.msra.mxu0 %v106_v60  ;;  %332 = vmatprep.subr.mxu1 %v214_v43 }
  0x28   :  { %163 = vmatprep.subr.mxu0 %v105_v62  ;;  %333 = vmatpush3.msra.mxu1 %v198_v44 }
  0x29   :  { %164 = vmatpush2.msra.mxu0 %v104_v0  ;;  %334 = vmatprep.subr.mxu1 %v213_v45 }
  0x2a   :  { %165 = vmatprep.subr.mxu0 %v103_v2  ;;  %335 = vmatpush3.msra.mxu1 %v197_v46 }
  0x2b   :  { %166 = vmatpush2.msra.mxu0 %v102_v4  ;;  %336 = vmatprep.subr.mxu1 %v212_v47 }
  0x2c   :  { %167 = vmatprep.subr.mxu0 %v101_v6  ;;  %337 = vmatpush3.msra.mxu1 %v196_v48 }
  0x2d   :  { %168 = vmatpush2.msra.mxu0 %v100_v8 }
  0x2e   :  { %169 = vmatprep.subr.mxu0 %v99_v10 }
  0x2f   :  { %170 = vmatpush2.msra.mxu0 %v98_v12 }
  0x30   :  { %171 = vmatprep.subr.mxu0 %v97_v14 }
  0x31   :  { %172 = vmatpush2.msra.mxu0 %v96_v16 }
  0x32   :  { %173 = vmatprep.subr.mxu0 %v95_v18 }
  0x33   :  { %174 = vmatpush2.msra.mxu0 %v94_v21 }
  0x34   :  { %175 = vmatprep.subr.mxu0 %v93_v23 }
  0x35   :  { %176 = vmatpush2.msra.mxu0 %v92_v25 }
  0x36   :  { %177 = vmatprep.subr.mxu0 %v91_v27 }
  0x37   :  { %178 = vmatpush2.msra.mxu0 %v90_v28 }
  0x38   :  { %179 = vmatprep.subr.mxu0 %v89_v29 }
  0x39   :  { %180 = vmatpush2.msra.mxu0 %v88_v19 }
  0x3a   :  { %181 = vmatprep.subr.mxu0 %v87_v33 }
  0x3b   :  { %182 = vmatpush2.msra.mxu0 %v86_v35 }
  0x3c   :  { %183 = vmatprep.subr.mxu0 %v85_v36 }
  0x3d   :  { %184 = vmatpush2.msra.mxu0 %v84_v30 }
  0x3e   :  { %185 = vmatprep.subr.mxu0 %v83_v39 }
  0x3f   :  { %186 = vmatpush2.msra.mxu0 %v82_v40 }
  0x40   :  { %187 = vmatprep.subr.mxu0 %v81_v41 }
  0x41   :  { %188 = vmatpush2.msra.mxu0 %v80_v31 }
  0x42   :  { %190 = vmatmul.mubr.f32.vlgmr.msra.gmra.mxu0 %v46_v42 }
 0x102   :  { %v191_v52 = vpop.f32.mrf.mxu0 }
 0x103   :  { %v192_v55 = vadd.f32 %v191_v52, %v118_v51 }
 0x104   :  { %v193_v53 = vpop.f32.mrf.mxu0 }
 0x105   :  { %v194_v54 = vadd.f32 %v193_v53, %v122_v50 }
 0x107   :  { %293 = vmatprep.mubr.f32.mxu1 %v194_v54 }
 0x108   :  { %294 = vmatmul.mubr.f32.vlgmr.msra.gmra.mxu1 %v192_v55 }
 0x1c8   :  { %v338_v56 = vpop.f32.mrf.mxu1 }
 0x1ca   :  { %v339_v58 = vpop.f32.mrf.mxu1 }
 0x1cb   :  { %v340_v59 = vadd.f32 %v339_v58, %v338_v56 }
 0x1cd   :  { %v296_v60 = vadd.f32 %v340_v59, %v228_v57 }
 0x1cf   :  { %299 = vst [vmem:[%s696_s4] sm:$0xff] %v296_v60 }

</bundles_post_ra>
